<compile_context>
chip_gen: v6e
topology: v6e:2x2x1
jax: 0.10.0
libtpu: 0.0.40
codegen_flags: <defaults>
</compile_context>

<pallas_src>
import functools

import jax
import jax.numpy as jnp
import numpy as np
from jax import lax
from jax.experimental import pallas as pl
from jax.experimental.pallas import tpu as pltpu

_LANE = 128
_SUBLANE = 8
_VMEM_LIMIT = 32 * 1024 * 1024  # explicit, safe on v5e/v6e/v7x


def _round_up(x, m):
    return (x + m - 1) // m * m


def _pick_row_tiling(m_rows, tm_max=512):
    """Pad M to a multiple of 8 and pick a row-tile size.

    Prefers an even (>=2) tile count so dimension_semantics=("parallel",) can shard
    the grid across both v7x TensorCores; tm capped at tm_max so double-buffered A
    tiles + resident weights stay well inside VMEM on every generation.
    """
    mp = _round_up(m_rows, _SUBLANE)
    if 2 * _SUBLANE <= mp <= 2 * tm_max:
        tm = _round_up((mp + 1) // 2, _SUBLANE)
        mp = 2 * tm
    else:
        tm = min(tm_max, mp)
        mp = _round_up(mp, tm)
    return mp, tm


# ----------------------------- Pallas kernels ------------------------------ #
def _conv_kernel(a_ref, b_ref, bias_ref, o_ref, *, relu):
    acc = jnp.dot(a_ref[...], b_ref[...], preferred_element_type=jnp.float32)
    acc = acc + bias_ref[...]
    if relu:
        acc = jnp.maximum(acc, 0.0)
    o_ref[...] = acc.astype(o_ref.dtype)


def _deconv_head_kernel(a_ref, b1_ref, bias1_ref, b2_ref, bias2_ref, o_ref):
    # phase-decomposed ConvTranspose2d(k=4, s=2, p=1) + ReLU  (4*C = 128 lanes wide)
    z = jnp.dot(a_ref[...], b1_ref[...], preferred_element_type=jnp.float32)
    z = jnp.maximum(z + bias1_ref[...], 0.0)
    # fused 1x1 head (block-diagonal per-phase weight); tiny second dot kept in f32
    y = jnp.dot(z, b2_ref[...], preferred_element_type=jnp.float32)
    o_ref[...] = (y + bias2_ref[...]).astype(o_ref.dtype)


# ----------------------------- Pallas wrappers ------------------------------ #
def conv_matmul(a, b, bias, *, relu, tm_max=512):
    """C = A @ B + bias (+ReLU). bf16 MXU operands, f32 accum, 128-lane-padded output."""
    m_rows, k = a.shape
    kb, n = b.shape
    assert k == kb
    kp = _round_up(k, _SUBLANE)
    np_ = _round_up(n, _LANE)
    mp, tm = _pick_row_tiling(m_rows, tm_max)

    a_p = jnp.zeros((mp, kp), jnp.bfloat16).at[:m_rows, :k].set(a.astype(jnp.bfloat16))
    b_p = jnp.zeros((kp, np_), jnp.bfloat16).at[:k, :n].set(b.astype(jnp.bfloat16))
    bias_p = jnp.zeros((1, np_), jnp.float32).at[0, :n].set(bias.astype(jnp.float32))

    out = pl.pallas_call(
        functools.partial(_conv_kernel, relu=relu),
        out_shape=jax.ShapeDtypeStruct((mp, np_), jnp.float32),
        grid=(mp // tm,),
        in_specs=[
            pl.BlockSpec((tm, kp), lambda i: (i, 0)),    # row tile of patches
            pl.BlockSpec((kp, np_), lambda i: (0, 0)),   # weight, VMEM-resident
            pl.BlockSpec((1, np_), lambda i: (0, 0)),    # bias row
        ],
        out_specs=pl.BlockSpec((tm, np_), lambda i: (i, 0)),  # lane-dense stores
        compiler_params=pltpu.CompilerParams(
            dimension_semantics=("parallel",),
            vmem_limit_bytes=_VMEM_LIMIT),
    )(a_p, b_p, bias_p)
    return out[:m_rows, :n]


def deconv_head_matmul(a, b1, bias1, b2, bias2, *, tm_max=512):
    """Fused: (A @ B1 + bias1 -> ReLU) @ B2 + bias2. Lane-padded output."""
    m_rows, k = a.shape
    k1, n1 = b1.shape
    n1b, n2 = b2.shape
    assert k == k1 and n1 == n1b
    kp = _round_up(k, _SUBLANE)
    n1p = _round_up(n1, _LANE)
    n2p = _round_up(n2, _LANE)
    mp, tm = _pick_row_tiling(m_rows, tm_max)

    a_p = jnp.zeros((mp, kp), jnp.bfloat16).at[:m_rows, :k].set(a.astype(jnp.bfloat16))
    b1_p = jnp.zeros((kp, n1p), jnp.bfloat16).at[:k, :n1].set(b1.astype(jnp.bfloat16))
    bias1_p = jnp.zeros((1, n1p), jnp.float32).at[0, :n1].set(bias1.astype(jnp.float32))
    b2_p = jnp.zeros((n1p, n2p), jnp.float32).at[:n1, :n2].set(b2.astype(jnp.float32))
    bias2_p = jnp.zeros((1, n2p), jnp.float32).at[0, :n2].set(bias2.astype(jnp.float32))

    out = pl.pallas_call(
        _deconv_head_kernel,
        out_shape=jax.ShapeDtypeStruct((mp, n2p), jnp.float32),
        grid=(mp // tm,),
        in_specs=[
            pl.BlockSpec((tm, kp), lambda i: (i, 0)),
            pl.BlockSpec((kp, n1p), lambda i: (0, 0)),
            pl.BlockSpec((1, n1p), lambda i: (0, 0)),
            pl.BlockSpec((n1p, n2p), lambda i: (0, 0)),
            pl.BlockSpec((1, n2p), lambda i: (0, 0)),
        ],
        out_specs=pl.BlockSpec((tm, n2p), lambda i: (i, 0)),
        compiler_params=pltpu.CompilerParams(
            dimension_semantics=("parallel",),
            vmem_limit_bytes=_VMEM_LIMIT),
    )(a_p, b1_p, bias1_p, b2_p, bias2_p)
    return out[:m_rows, :n2]


# ------------------------------- JAX glue ----------------------------------- #
def im2col(x, kh, kw, stride, pad):
    """x: (N,H,W,C) -> patches (N*Ho*Wo, kh*kw*C), patch index = (i*kw + j)*C + c."""
    x = jnp.pad(x, ((0, 0), (pad, pad), (pad, pad), (0, 0)))
    n, h, w, c = x.shape
    ho = (h - kh) // stride + 1
    wo = (w - kw) // stride + 1
    cols = []
    for i in range(kh):
        for j in range(kw):
            cols.append(x[:, i:i + stride * ho:stride, j:j + stride * wo:stride, :])
    patches = jnp.concatenate(cols, axis=-1)
    return patches.reshape(n * ho * wo, kh * kw * c), (n, ho, wo)


def _deconv_phase_weight(wt):
    """ConvTranspose2d(k=4,s=2,p=1) weight (Cin,Cout,4,4) -> (9*Cin, 4*Cout).

    Acts on 3x3/stride-1/pad-1 im2col patches of the UNDILATED input; column group
    (rh, rw) produces output pixel (2m+rh, 2n+rw).  Subpixel/phase decomposition:
    no zero-dilated activations, K = 9*Cin instead of 16*Cin.
    # TODO(synk): exact 4-phase 2x2 split (K = 4*Cin) needs per-phase coarse-index
    # shifts at the boundary; left as a follow-up.
    """
    cin, cout = wt.shape[0], wt.shape[1]
    taps = {0: ((0, 3), (1, 1)), 1: ((1, 2), (2, 0))}   # phase parity r -> ((d, k), ...)
    w = jnp.zeros((3, 3, cin, 2, 2, cout), jnp.float32)
    for rh, hts in taps.items():
        for (di, kh) in hts:
            for rw, wts in taps.items():
                for (dj, kw) in wts:
                    w = w.at[di, dj, :, rh, rw, :].set(wt[:, :, kh, kw])
    return w.reshape(9 * cin, 4 * cout)


def _phase_head_weight(head_w, head_b, cin):
    """head1 1x1 conv weight (num_kp, Cin, 1, 1) -> block-diag (4*Cin, 4*num_kp)."""
    nk = head_w.shape[0]
    hw = head_w.reshape(nk, cin).T.astype(jnp.float32)   # (Cin, nk)
    b2 = jnp.zeros((4 * cin, 4 * nk), jnp.float32)
    for p in range(4):
        b2 = b2.at[p * cin:(p + 1) * cin, p * nk:(p + 1) * nk].set(hw)
    bias2 = jnp.tile(head_b.astype(jnp.float32), 4)
    return b2, bias2


def init_params(key, in_ch=3, feature_dim=32, num_keypoints=16):
    k1, k2, k3 = jax.random.split(key, 3)
    return {
        # backbone stand-in: Conv2d(in_ch, feature_dim, 3, stride=2, padding=1) + ReLU  (OIHW)
        "backbone_w": jax.random.normal(k1, (feature_dim, in_ch, 3, 3), jnp.float32) * 0.1,
        "backbone_b": jnp.zeros((feature_dim,), jnp.float32),
        # upsampling1 stand-in: ConvTranspose2d(fd, fd, 4, stride=2, padding=1) + ReLU (IOHW, torch)
        "up_w": jax.random.normal(k2, (feature_dim, feature_dim, 4, 4), jnp.float32) * 0.05,
        "up_b": jnp.zeros((feature_dim,), jnp.float32),
        # head1: Conv2d(feature_dim, num_keypoints, 1) — normal_(std=0.001), bias 0 (per __init__)
        "head_w": jax.random.normal(k3, (num_keypoints, feature_dim, 1, 1), jnp.float32) * 0.001,
        "head_b": jnp.zeros((num_keypoints,), jnp.float32),
    }


def pose_resnet_gvb_forward(x_nchw, params):
    x = jnp.transpose(x_nchw, (0, 2, 3, 1)).astype(jnp.float32)   # NCHW -> NHWC
    cin = x.shape[-1]

    # ---- backbone: 3x3 conv, stride 2, pad 1, + ReLU (one Pallas matmul) ----
    a, (n, ho, wo) = im2col(x, 3, 3, 2, 1)
    bw = jnp.transpose(params["backbone_w"], (2, 3, 1, 0)).reshape(3 * 3 * cin, -1)
    feat = conv_matmul(a, bw, params["backbone_b"], relu=True).reshape(n, ho, wo, -1)

    # ---- upsampling1 (ConvTranspose2d k=4,s=2,p=1 + ReLU) fused with head1 (1x1 conv) ----
    nb, h, w, c = feat.shape
    nk = params["head_w"].shape[0]
    a, _ = im2col(feat, 3, 3, 1, 1)                       # (N*H*W, 9*C), undilated input
    b1 = _deconv_phase_weight(params["up_w"])             # (9*C, 4*C)
    bias1 = jnp.tile(params["up_b"].astype(jnp.float32), 4)
    b2, bias2 = _phase_head_weight(params["head_w"], params["head_b"], c)
    y = deconv_head_matmul(a, b1, bias1, b2, bias2)       # (N*H*W, 4*nk)

    # interleave the 4 output phases: row layout [ph(0,0) | ph(0,1) | ph(1,0) | ph(1,1)]
    y = y.reshape(nb, h, w, 2, 2, nk)
    y = jnp.transpose(y, (0, 1, 3, 2, 4, 5)).reshape(nb, 2 * h, 2 * w, nk)
    return jnp.transpose(y, (0, 3, 1, 2))                 # NHWC -> NCHW


# ----------------------------- pure-XLA reference --------------------------- #
def ref_forward(x_nchw, params):
    y = lax.conv_general_dilated(x_nchw, params["backbone_w"], (2, 2), ((1, 1), (1, 1)))
    y = jax.nn.relu(y + params["backbone_b"][None, :, None, None])
    wf = jnp.transpose(jnp.flip(params["up_w"], (2, 3)), (1, 0, 2, 3))  # (Cout, Cin, kh, kw)
    y = lax.conv_general_dilated(y, wf, (1, 1), ((2, 2), (2, 2)), lhs_dilation=(2, 2))
    y = jax.nn.relu(y + params["up_b"][None, :, None, None])
    y = lax.conv_general_dilated(y, params["head_w"], (1, 1), ((0, 0), (0, 0)))
    return y + params["head_b"][None, :, None, None]


if __name__ == "__main__":
    key = jax.random.PRNGKey(0)
    kx, kp = jax.random.split(key)
    # small shapes: batch=2, in_ch=3, spatial=16x16, feature_dim=32, num_keypoints=16
    x = jax.random.normal(kx, (2, 3, 16, 16), jnp.float32)
    params = init_params(kp, in_ch=3, feature_dim=32, num_keypoints=16)

    out = jax.block_until_ready(jax.jit(pose_resnet_gvb_forward)(x, params))
    ref = jax.block_until_ready(jax.jit(ref_forward)(x, params))

    assert out.shape == (2, 16, 16, 16), out.shape
    np.testing.assert_allclose(np.asarray(out), np.asarray(ref), rtol=2e-2, atol=3e-4)
    print("KERNEL_OK")
</pallas_src>

<mosaic_0001>
module attributes {stable_mosaic.version = 11 : i64} {
  func.func @_conv_kernel(%arg0: i32, %arg1: memref<64x32xbf16, #tpu.memory_space<vmem>>, %arg2: memref<32x128xbf16, #tpu.memory_space<vmem>>, %arg3: memref<1x128xf32, #tpu.memory_space<vmem>>, %arg4: memref<64x128xf32, #tpu.memory_space<vmem>>) attributes {dimension_semantics = [#tpu.dimension_semantics<parallel>], iteration_bounds = array<i64: 2>, scalar_prefetch = 0 : i64, scratch_operands = 0 : i64, tpu.core_type = #tpu.core_type<tc>, window_params = [{transform_indices = @transform_0, window_bounds = array<i64: 64, 32>}, {pipeline_mode = #tpu.pipeline_mode<synchronous>, transform_indices = @transform_1, window_bounds = array<i64: 32, 128>}, {pipeline_mode = #tpu.pipeline_mode<synchronous>, transform_indices = @transform_2, window_bounds = array<i64: 1, 128>}, {transform_indices = @transform_3, window_bounds = array<i64: 64, 128>}]} {
    %c0 = arith.constant 0 : index
    %c0_0 = arith.constant 0 : index
    %0 = vector.load %arg1[%c0, %c0_0] : memref<64x32xbf16, #tpu.memory_space<vmem>>, vector<64x32xbf16>
    %c0_1 = arith.constant 0 : index
    %c0_2 = arith.constant 0 : index
    %1 = vector.load %arg2[%c0_1, %c0_2] : memref<32x128xbf16, #tpu.memory_space<vmem>>, vector<32x128xbf16>
    %cst = arith.constant dense<0.000000e+00> : vector<64x128xf32>
    %2 = tpu.matmul %0, %1, %cst {dimension_numbers = #tpu.dot_dimension_numbers<[1], [0], [0], [1], [0, 0, 1, 1], [], []>} : vector<64x32xbf16>, vector<32x128xbf16>, vector<64x128xf32> -> vector<64x128xf32>
    %c0_3 = arith.constant 0 : index
    %c0_4 = arith.constant 0 : index
    %3 = vector.load %arg3[%c0_3, %c0_4] : memref<1x128xf32, #tpu.memory_space<vmem>>, vector<1x128xf32>
    %4 = vector.broadcast %3 : vector<1x128xf32> to vector<64x128xf32>
    %5 = arith.addf %2, %4 : vector<64x128xf32>
    %cst_5 = arith.constant 0.000000e+00 : f32
    %6 = vector.broadcast %cst_5 : f32 to vector<64x128xf32>
    %7 = arith.maximumf %5, %6 : vector<64x128xf32>
    %c0_6 = arith.constant 0 : index
    %c0_7 = arith.constant 0 : index
    %8 = vector.load %arg4[%c0_6, %c0_7] : memref<64x128xf32, #tpu.memory_space<vmem>>, vector<64x128xf32>
    tpu.vector_store %arg4[%c0_6, %c0_7], %7 {strides = array<i32>} : memref<64x128xf32, #tpu.memory_space<vmem>>, vector<64x128xf32>,
    return
  }
  func.func @transform_0(%arg0: i32) -> (i32, i32) {
    %c0_i32 = arith.constant 0 : i32
    %c0_i32_0 = arith.constant 0 : i32
    return %arg0, %c0_i32 : i32, i32
  }
  func.func @transform_1(%arg0: i32) -> (i32, i32) {
    %c0_i32 = arith.constant 0 : i32
    %c0_i32_0 = arith.constant 0 : i32
    %c0_i32_1 = arith.constant 0 : i32
    return %c0_i32, %c0_i32_0 : i32, i32
  }
  func.func @transform_2(%arg0: i32) -> (i32, i32) {
    %c0_i32 = arith.constant 0 : i32
    %c0_i32_0 = arith.constant 0 : i32
    %c0_i32_1 = arith.constant 0 : i32
    return %c0_i32, %c0_i32_0 : i32, i32
  }
  func.func @transform_3(%arg0: i32) -> (i32, i32) {
    %c0_i32 = arith.constant 0 : i32
    %c0_i32_0 = arith.constant 0 : i32
    return %arg0, %c0_i32 : i32, i32
  }
}

module attributes {stable_mosaic.version = 11 : i64} {
  func.func @_deconv_head_kernel(%arg0: i32, %arg1: memref<64x288xbf16, #tpu.memory_space<vmem>>, %arg2: memref<288x128xbf16, #tpu.memory_space<vmem>>, %arg3: memref<1x128xf32, #tpu.memory_space<vmem>>, %arg4: memref<128x128xf32, #tpu.memory_space<vmem>>, %arg5: memref<1x128xf32, #tpu.memory_space<vmem>>, %arg6: memref<64x128xf32, #tpu.memory_space<vmem>>) attributes {dimension_semantics = [#tpu.dimension_semantics<parallel>], iteration_bounds = array<i64: 2>, scalar_prefetch = 0 : i64, scratch_operands = 0 : i64, tpu.core_type = #tpu.core_type<tc>, window_params = [{transform_indices = @transform_0, window_bounds = array<i64: 64, 288>}, {pipeline_mode = #tpu.pipeline_mode<synchronous>, transform_indices = @transform_1, window_bounds = array<i64: 288, 128>}, {pipeline_mode = #tpu.pipeline_mode<synchronous>, transform_indices = @transform_2, window_bounds = array<i64: 1, 128>}, {pipeline_mode = #tpu.pipeline_mode<synchronous>, transform_indices = @transform_3, window_bounds = array<i64: 128, 128>}, {pipeline_mode = #tpu.pipeline_mode<synchronous>, transform_indices = @transform_4, window_bounds = array<i64: 1, 128>}, {transform_indices = @transform_5, window_bounds = array<i64: 64, 128>}]} {
    %c0 = arith.constant 0 : index
    %c0_0 = arith.constant 0 : index
    %0 = vector.load %arg1[%c0, %c0_0] : memref<64x288xbf16, #tpu.memory_space<vmem>>, vector<64x288xbf16>
    %c0_1 = arith.constant 0 : index
    %c0_2 = arith.constant 0 : index
    %1 = vector.load %arg2[%c0_1, %c0_2] : memref<288x128xbf16, #tpu.memory_space<vmem>>, vector<288x128xbf16>
    %cst = arith.constant dense<0.000000e+00> : vector<64x128xf32>
    %2 = tpu.matmul %0, %1, %cst {dimension_numbers = #tpu.dot_dimension_numbers<[1], [0], [0], [1], [0, 0, 1, 1], [], []>} : vector<64x288xbf16>, vector<288x128xbf16>, vector<64x128xf32> -> vector<64x128xf32>
    %c0_3 = arith.constant 0 : index
    %c0_4 = arith.constant 0 : index
    %3 = vector.load %arg3[%c0_3, %c0_4] : memref<1x128xf32, #tpu.memory_space<vmem>>, vector<1x128xf32>
    %4 = vector.broadcast %3 : vector<1x128xf32> to vector<64x128xf32>
    %5 = arith.addf %2, %4 : vector<64x128xf32>
    %cst_5 = arith.constant 0.000000e+00 : f32
    %6 = vector.broadcast %cst_5 : f32 to vector<64x128xf32>
    %7 = arith.maximumf %5, %6 : vector<64x128xf32>
    %c0_6 = arith.constant 0 : index
    %c0_7 = arith.constant 0 : index
    %8 = vector.load %arg4[%c0_6, %c0_7] : memref<128x128xf32, #tpu.memory_space<vmem>>, vector<128x128xf32>
    %cst_8 = arith.constant dense<0.000000e+00> : vector<64x128xf32>
    %9 = tpu.matmul %7, %8, %cst_8 {dimension_numbers = #tpu.dot_dimension_numbers<[1], [0], [0], [1], [0, 0, 1, 1], [], []>} : vector<64x128xf32>, vector<128x128xf32>, vector<64x128xf32> -> vector<64x128xf32>
    %c0_9 = arith.constant 0 : index
    %c0_10 = arith.constant 0 : index
    %10 = vector.load %arg5[%c0_9, %c0_10] : memref<1x128xf32, #tpu.memory_space<vmem>>, vector<1x128xf32>
    %11 = vector.broadcast %10 : vector<1x128xf32> to vector<64x128xf32>
    %12 = arith.addf %9, %11 : vector<64x128xf32>
    %c0_11 = arith.constant 0 : index
    %c0_12 = arith.constant 0 : index
    %13 = vector.load %arg6[%c0_11, %c0_12] : memref<64x128xf32, #tpu.memory_space<vmem>>, vector<64x128xf32>
    tpu.vector_store %arg6[%c0_11, %c0_12], %12 {strides = array<i32>} : memref<64x128xf32, #tpu.memory_space<vmem>>, vector<64x128xf32>,
    return
  }
  func.func @transform_0(%arg0: i32) -> (i32, i32) {
    %c0_i32 = arith.constant 0 : i32
    %c0_i32_0 = arith.constant 0 : i32
    return %arg0, %c0_i32 : i32, i32
  }
  func.func @transform_1(%arg0: i32) -> (i32, i32) {
    %c0_i32 = arith.constant 0 : i32
    %c0_i32_0 = arith.constant 0 : i32
    %c0_i32_1 = arith.constant 0 : i32
    return %c0_i32, %c0_i32_0 : i32, i32
  }
  func.func @transform_2(%arg0: i32) -> (i32, i32) {
    %c0_i32 = arith.constant 0 : i32
    %c0_i32_0 = arith.constant 0 : i32
    %c0_i32_1 = arith.constant 0 : i32
    return %c0_i32, %c0_i32_0 : i32, i32
  }
  func.func @transform_3(%arg0: i32) -> (i32, i32) {
    %c0_i32 = arith.constant 0 : i32
    %c0_i32_0 = arith.constant 0 : i32
    %c0_i32_1 = arith.constant 0 : i32
    return %c0_i32, %c0_i32_0 : i32, i32
  }
  func.func @transform_4(%arg0: i32) -> (i32, i32) {
    %c0_i32 = arith.constant 0 : i32
    %c0_i32_0 = arith.constant 0 : i32
    %c0_i32_1 = arith.constant 0 : i32
    return %c0_i32, %c0_i32_0 : i32, i32
  }
  func.func @transform_5(%arg0: i32) -> (i32, i32) {
    %c0_i32 = arith.constant 0 : i32
    %c0_i32_0 = arith.constant 0 : i32
    return %arg0, %c0_i32 : i32, i32
  }
}

</mosaic_0001>

<bundles_post_ra>
// kernel: pose_resnet_gvb_forward.2
= control target key start
LH: loop header
LB: loop body
LE: loop exit
PB: predicated region body
PF: predicated region fallthrough
CT: control target
= control target key end

     0   :  { %s462_s12 = smov 0   ;;  %s488_s0 = inlined_call_operand.vmem [shape: bf16[128,32], index: 0, kind: input, shape index: {}]   ;;  %s489_s1 = inlined_call_operand.vmem [shape: bf16[32,128], index: 1, kind: input, shape index: {}]   ;;  %s490_s2 = inlined_call_operand.vmem [shape: f32[1,128], index: 2, kind: input, shape index: {}]   ;;  %s491_s3 = inlined_call_operand.vmem [shape: f32[128,128], index: 3, kind: output, shape index: {}]  }
   0x1 LB: > { %s376_s13 = sadd.s32 4294967295, %s440_s12   ;;  %p380_p0 = scmp.ge.s32.totalorder %s440_s12, 1  ;;  %s440_s12 = sphi %s462_s12, %s13_s12  }
   0x2   : > { %p138_p1 = scmp.lt.s32.totalorder %s440_s12, 3 }
   0x4   : > { %p139_p2 = pnand %p380_p0, %p138_p1 }
   0x5   : > { %s381_s16 = sshll.u32 (!%p139_p2), %s376_s13, 3 }
   0x6   : > { %142 = sbr.rel (%p139_p2) target bundleno = 224 (0xe0), region = 32  ;;  %p163_p3 = scmp.lt.s32.totalorder (!%p139_p2), %s381_s16, 15 }
   0xb   : > { %v428_v0 = vld [vmem:[%s489_s1 + $0x8] sm:$0xff]   ;;  %v429_v1 = vld [vmem:[%s489_s1] sm:$0xff]   ;;  %s493_s16 = smov (!%p163_p3, %s381_s16), 15  ;;  %vm226_vm0 = vcmask 261120  }
   0xc   : > { %404 = vmatprep.subr.bf16.mxu0 %v428_v0  ;;  %416 = vmatprep.subr.bf16.mxu1 %v428_v0  ;;  %s382_s19 = sshll.u32 %s493_s16, 2  ;;  %v385_v6 = vld [vmem:[%s490_s2] ss:$0 sm:$0xff]  ;;  %s384_s25 = sshll.u32 %s493_s16, 3 }
   0xd   : > { %405 = vmatpush3.bf16.msra.mxu0 %v428_v0  ;;  %418 = vmatpush3.bf16.msra.mxu1 %v428_v0  ;;  %s166_s22 = scalar_lea.vmem %s488_s0, %s382_s19  ;;  %s172_s28 = scalar_lea.vmem %s491_s3, %s384_s25 }
   0xe   : > { %406 = vmatprep.subr.bf16.mxu0 %v429_v1  ;;  %417 = vmatprep.subr.bf16.mxu1 %v429_v1  ;;  %v430_v2 = vld [vmem:[%s166_s22] sm:$0xff]   ;;  %v431_v3 = vld [vmem:[%s166_s22 + $0x10] sm:$0xff]   ;;  %v432_v4 = vld [vmem:[%s166_s22 + $0x8] sm:$0xff]  }
   0xf   : > { %408 = vmatprep.mubr.msk.bf16.mxu0 %vm226_vm0, %v430_v2  ;;  %412 = vmatprep.mubr.msk.bf16.mxu1 %vm226_vm0, %v431_v3  ;;  %v433_v5 = vld [vmem:[%s166_s22 + $0x18] sm:$0xff]  }
  0x11   : > { %407 = vmatpush3.bf16.msra.mxu0 %v429_v1  ;;  %419 = vmatpush3.bf16.msra.mxu1 %v429_v1 }
  0x14   : > { %409 = vmatmul.mubr.msk.bf16.vlgmr.msra.gmra.mxu0 %vm226_vm0, %v432_v4  ;;  %413 = vmatmul.mubr.msk.bf16.vlgmr.msra.gmra.mxu1 %vm226_vm0, %v433_v5 }
  0xd4   : > { %v410_v7 = vpop.f32.mrf.mxu0  ;;  %v414_v9 = vpop.f32.mrf.mxu1 }
  0xd5   : > { %v282_v8 = vadd.f32 %v410_v7, %v385_v6  ;;  %v298_v10 = vadd.f32 %v414_v9, %v385_v6 }
  0xd6   : > { %v273_v11 = vpop.f32.mrf.mxu0  ;;  %v289_v14 = vpop.f32.mrf.mxu1 }
  0xd7   : > { %v306_v12 = vmax.f32 %v282_v8, 0.0  ;;  %v274_v13 = vadd.f32 %v385_v6, %v273_v11  ;;  %v310_v15 = vmax.f32 %v298_v10, 0.0  ;;  %v290_v16 = vadd.f32 %v385_v6, %v289_v14 }
  0xd8   : > { %v411_v17 = vpop.f32.mrf.mxu0  ;;  %v415_v20 = vpop.f32.mrf.mxu1 }
  0xd9   : > { %314 = vst [vmem:[%s172_s28 + $0x10] sm:$0xff] %v306_v12  ;;  %v304_v18 = vmax.f32 %v274_v13, 0.0  ;;  %v285_v19 = vadd.f32 %v411_v17, %v385_v6  ;;  %318 = vst [vmem:[%s172_s28 + $0x30] sm:$0xff] %v310_v15  ;;  %v308_v21 = vmax.f32 %v290_v16, 0.0  ;;  %v301_v22 = vadd.f32 %v415_v20, %v385_v6 }
  0xda   : > { %v276_v23 = vpop.f32.mrf.mxu0  ;;  %v292_v26 = vpop.f32.mrf.mxu1 }
  0xdb   : > { %312 = vst [vmem:[%s172_s28] sm:$0xff] %v304_v18  ;;  %v307_v24 = vmax.f32 %v285_v19, 0.0  ;;  %v277_v25 = vadd.f32 %v385_v6, %v276_v23  ;;  %316 = vst [vmem:[%s172_s28 + $0x20] sm:$0xff] %v308_v21  ;;  %v311_v27 = vmax.f32 %v301_v22, 0.0  ;;  %v293_v28 = vadd.f32 %v385_v6, %v292_v26 }
  0xdd   : > { %315 = vst [vmem:[%s172_s28 + $0x18] sm:$0xff] %v307_v24  ;;  %v305_v29 = vmax.f32 %v277_v25, 0.0  ;;  %319 = vst [vmem:[%s172_s28 + $0x38] sm:$0xff] %v311_v27  ;;  %v309_v30 = vmax.f32 %v293_v28, 0.0 }
  0xdf   : > { %313 = vst [vmem:[%s172_s28 + $0x8] sm:$0xff] %v305_v29  ;;  %317 = vst [vmem:[%s172_s28 + $0x28] sm:$0xff] %v309_v30 }
  0xe0 PF: > { %s13_s12 = sadd.s32 1, %s440_s12  }
  0xe1   : > { %p10_p4 = scmp.ge.s32.totalorder %s13_s12, 4  }
  0xe3   :  { %12 = sbr.rel (!%p10_p4) target bundleno = 1 (0x1), region = 62 }

// kernel: tile.13
= control target key start
LH: loop header
LB: loop body
LE: loop exit
PB: predicated region body
PF: predicated region fallthrough
CT: control target
= control target key end

     0   :  { %s22_s0 = inlined_call_operand.vmem [shape: f32[32], index: 0, kind: input, shape index: {}]   ;;  %s23_s1 = inlined_call_operand.vmem [shape: f32[4,32], index: 1, kind: output, shape index: {}]  }
   0x1   :  { %v4_v0 = vld [vmem:[%s22_s0] ss:$0 sm:$0xff] }
   0x2   :  { %5 = vst [vmem:[%s23_s1] sm:$0xf] %v4_v0 }

// kernel: pose_resnet_gvb_forward.3
= control target key start
LH: loop header
LB: loop body
LE: loop exit
PB: predicated region body
PF: predicated region fallthrough
CT: control target
= control target key end

     0   :  { %s1056_s18 = smov 0   ;;  %s1203_s0 = inlined_call_operand.vmem [shape: bf16[128,288], index: 0, kind: input, shape index: {}]   ;;  %s1204_s1 = inlined_call_operand.vmem [shape: bf16[288,128], index: 1, kind: input, shape index: {}]   ;;  %s1205_s2 = inlined_call_operand.vmem [shape: f32[1,128], index: 2, kind: input, shape index: {}]   ;;  %s1206_s3 = inlined_call_operand.vmem [shape: f32[128,128], index: 3, kind: input, shape index: {}]   ;;  %s1207_s4 = inlined_call_operand.vmem [shape: f32[1,128], index: 4, kind: input, shape index: {}]   ;;  %s1208_s5 = inlined_call_operand.vmem [shape: f32[128,128], index: 5, kind: output, shape index: {}]  }
   0x1 LB: > { %s802_s19 = sadd.s32 4294967295, %s1024_s18   ;;  %p806_p0 = scmp.ge.s32.totalorder %s1024_s18, 1  ;;  %s1024_s18 = sphi %s1056_s18, %s15_s18  }
   0x2   : > { %p189_p1 = scmp.lt.s32.totalorder %s1024_s18, 3 }
   0x4   : > { %p190_p2 = pnand %p806_p0, %p189_p1 }
   0x5   : > { %s807_s22 = sshll.u32 (!%p190_p2), %s802_s19, 3 }
   0x6   : > { %193 = sbr.rel (%p190_p2) target bundleno = 473 (0x1d9), region = 40  ;;  %p219_p3 = scmp.lt.s32.totalorder (!%p190_p2), %s807_s22, 15 }
   0xb   : > { %v984_v0 = vld [vmem:[%s1204_s1 + $0x78] sm:$0xff]   ;;  %v986_v2 = vld [vmem:[%s1204_s1 + $0x70] sm:$0xff]   ;;  %v988_v4 = vld [vmem:[%s1204_s1 + $0x68] sm:$0xff]   ;;  %s1210_s22 = smov (!%p219_p3, %s807_s22), 15  ;;  %vm459_vm0 = vcmask 261120  }
   0xc   : > { %v985_v1 = vld [vmem:[%s1204_s1 + $0x38] sm:$0xff]   ;;  %849 = vmatprep.subr.bf16.mxu0 %v984_v0  ;;  %v987_v3 = vld [vmem:[%s1204_s1 + $0x30] sm:$0xff]   ;;  %v989_v5 = vld [vmem:[%s1204_s1 + $0x28] sm:$0xff]   ;;  %s975_s12 = smul.u32 12, %s1210_s22  ;;  %s810_s27 = sshll.u32 %s1210_s22, 3 }
   0xd   : > { %850 = vmatpush3.bf16.msra.mxu0 %v985_v1  ;;  %v990_v6 = vld [vmem:[%s1204_s1 + $0x60] sm:$0xff]   ;;  %v992_v8 = vld [vmem:[%s1204_s1 + $0x58] sm:$0xff]   ;;  %v999_v10 = vld [vmem:[%s1204_s1 + $0x88] sm:$0xff]   ;;  %s229_s7 = scalar_lea.vmem %s1208_s5, %s810_s27 }
   0xe   : > { %851 = vmatprep.subr.bf16.mxu0 %v986_v2  ;;  %v991_v7 = vld [vmem:[%s1204_s1 + $0x20] sm:$0xff]   ;;  %v993_v9 = vld [vmem:[%s1204_s1 + $0x18] sm:$0xff]   ;;  %s1103_s23 = scalar_lea.vmem %s1203_s0, %s975_s12  ;;  %v994_v11 = vld [vmem:[%s1204_s1 + $0x50] sm:$0xff]   ;;  %919 = vmatprep.subr.bf16.mxu1 %v999_v10 }
   0xf   : > { %v995_v12 = vld [vmem:[%s1204_s1 + $0x10] sm:$0xff]   ;;  %v996_v13 = vld [vmem:[%s1204_s1 + $0x48] sm:$0xff]   ;;  %920 = vmatpush3.bf16.msra.mxu1 %v999_v10  ;;  %v1004_v15 = vld [vmem:[%s1204_s1 + $0x80] sm:$0xff]  }
  0x10   : > { %v1003_v14 = vld [vmem:[%s1103_s23 + $0x4] ss:$12 sps:$4 sm:$0xff]   ;;  %v1005_v16 = vld [vmem:[%s1103_s23 + $0x8] ss:$12 sps:$4 sm:$0xff]   ;;  %921 = vmatprep.subr.bf16.mxu1 %v1004_v15  ;;  %v1006_v17 = vld [vmem:[%s1103_s23 + $0x20] ss:$12 sps:$4 sm:$0xff]  }
  0x11   : > { %852 = vmatpush3.bf16.msra.mxu0 %v987_v3  ;;  %504 = vmatprep.mubr.bf16.mxu0 %v1003_v14  ;;  %v997_v18 = vld [vmem:[%s1204_s1 + $0x8] sm:$0xff]   ;;  %v998_v19 = vld [vmem:[%s1204_s1 + $0x40] sm:$0xff]   ;;  %v625_v22 = vld [vmem:[%s1206_s3 + $0x78] sm:$0xff] }
  0x12   : > { %853 = vmatprep.subr.bf16.mxu0 %v988_v4  ;;  %923 = vmatprep.mubr.msk.bf16.mxu1 %vm459_vm0, %v1005_v16  ;;  %v1013_v20 = vld [vmem:[%s1103_s23 + $0x38] ss:$12 sps:$4 sm:$0xff]   ;;  %v624_v23 = vld [vmem:[%s1206_s3 + $0x70] sm:$0xff]  ;;  %v623_v25 = vld [vmem:[%s1206_s3 + $0x68] sm:$0xff] }
  0x13   : > { %922 = vmatpush3.bf16.msra.mxu1 %v1004_v15  ;;  %v1000_v21 = vld [vmem:[%s1204_s1] sm:$0xff]   ;;  %v1014_v24 = vld [vmem:[%s1103_s23 + $0x50] ss:$12 sps:$4 sm:$0xff]   ;;  %v619_v32 = vld [vmem:[%s1206_s3 + $0x48] sm:$0xff] }
  0x14   : > { %931 = vmatprep.subr.mxu1 %v625_v22  ;;  %v1001_v26 = vld [vmem:[%s1103_s23] ss:$12 sps:$4 sm:$0xff]   ;;  %v1007_v27 = vld [vmem:[%s1103_s23 + $0x1c] ss:$12 sps:$4 sm:$0xff]   ;;  %v620_v30 = vld [vmem:[%s1206_s3 + $0x50] sm:$0xff] }
  0x15   : > { %854 = vmatpush3.bf16.msra.mxu0 %v989_v5  ;;  %v622_v28 = vld [vmem:[%s1206_s3 + $0x60] sm:$0xff]  ;;  %v621_v29 = vld [vmem:[%s1206_s3 + $0x58] sm:$0xff]  ;;  %v1017_v38 = vld [vmem:[%s1103_s23 + $0x48] ss:$12 sps:$4 sm:$0xff]  }
  0x16   : > { %855 = vmatprep.subr.bf16.mxu0 %v990_v6  ;;  %924 = vmatmul.mubr.msk.bf16.vlgmr.msra.gmra.mxu1 %vm459_vm0, %v1006_v17  ;;  %v1009_v31 = vld [vmem:[%s1103_s23 + $0x18] ss:$12 sps:$4 sm:$0xff]   ;;  %v1010_v33 = vld [vmem:[%s1103_s23 + $0x34] ss:$12 sps:$4 sm:$0xff]   ;;  %v1012_v36 = vld [vmem:[%s1103_s23 + $0x30] ss:$12 sps:$4 sm:$0xff]  }
  0x17   : > { %927 = vmatprep.mubr.msk.bf16.mxu1 %vm459_vm0, %v1013_v20  ;;  %932 = vmatpush3.msra.mxu1 %v625_v22  ;;  %v618_v34 = vld [vmem:[%s1206_s3 + $0x40] sm:$0xff]  ;;  %v617_v35 = vld [vmem:[%s1206_s3 + $0x38] sm:$0xff]  ;;  %v616_v39 = vld [vmem:[%s1206_s3 + $0x30] sm:$0xff] }
  0x18   : > { %933 = vmatprep.subr.mxu1 %v624_v23  ;;  %v1015_v37 = vld [vmem:[%s1103_s23 + $0x4c] ss:$12 sps:$4 sm:$0xff]   ;;  %v614_v41 = vld [vmem:[%s1206_s3 + $0x20] sm:$0xff]  ;;  %v612_v43 = vld [vmem:[%s1206_s3 + $0x10] sm:$0xff] }
  0x19   : > { %856 = vmatpush3.bf16.msra.mxu0 %v991_v7  ;;  %934 = vmatpush3.msra.mxu1 %v624_v23  ;;  %v615_v40 = vld [vmem:[%s1206_s3 + $0x28] sm:$0xff]  ;;  %v613_v42 = vld [vmem:[%s1206_s3 + $0x18] sm:$0xff]  ;;  %v610_v45 = vld [vmem:[%s1206_s3] sm:$0xff] }
  0x1a   : > { %857 = vmatprep.subr.bf16.mxu0 %v992_v8  ;;  %935 = vmatprep.subr.mxu1 %v623_v25  ;;  %v611_v44 = vld [vmem:[%s1206_s3 + $0x8] sm:$0xff]  ;;  %v811_v50 = vld [vmem:[%s1205_s2] ss:$0 sm:$0xff] }
  0x1b   : > { %936 = vmatpush3.msra.mxu1 %v623_v25 }
  0x1c   : > { %937 = vmatprep.subr.mxu1 %v622_v28 }
  0x1d   : > { %858 = vmatpush3.bf16.msra.mxu0 %v993_v9  ;;  %938 = vmatpush3.msra.mxu1 %v622_v28 }
  0x1e   : > { %859 = vmatprep.subr.bf16.mxu0 %v994_v11  ;;  %928 = vmatmul.mubr.msk.bf16.gmra.mxu1 %vm459_vm0, %v1014_v24 }
  0x1f   : > { %939 = vmatprep.subr.mxu1 %v621_v29 }
  0x20   : > { %940 = vmatpush3.msra.mxu1 %v621_v29 }
  0x21   : > { %860 = vmatpush3.bf16.msra.mxu0 %v995_v12  ;;  %941 = vmatprep.subr.mxu1 %v620_v30 }
  0x22   : > { %861 = vmatprep.subr.bf16.mxu0 %v996_v13  ;;  %942 = vmatpush3.msra.mxu1 %v620_v30 }
  0x23   : > { %943 = vmatprep.subr.mxu1 %v619_v32 }
  0x24   : > { %944 = vmatpush3.msra.mxu1 %v619_v32 }
  0x25   : > { %862 = vmatpush3.bf16.msra.mxu0 %v997_v18  ;;  %945 = vmatprep.subr.mxu1 %v618_v34 }
  0x26   : > { %863 = vmatprep.subr.bf16.mxu0 %v998_v19  ;;  %946 = vmatpush3.msra.mxu1 %v618_v34 }
  0x27   : > { %947 = vmatprep.subr.mxu1 %v617_v35 }
  0x28   : > { %948 = vmatpush3.msra.mxu1 %v617_v35 }
  0x29   : > { %864 = vmatpush3.bf16.msra.mxu0 %v1000_v21  ;;  %949 = vmatprep.subr.mxu1 %v616_v39 }
  0x2a   : > { %950 = vmatpush3.msra.mxu1 %v616_v39  ;;  %v846_v39 = vld [vmem:[%s1207_s4] ss:$0 sm:$0xff] }
  0x2b   : > { %951 = vmatprep.subr.mxu1 %v615_v40 }
  0x2c   : > { %505 = vmatmul.mubr.bf16.vlgmr.msra.gmra.mxu0 %v1001_v26  ;;  %952 = vmatpush3.msra.mxu1 %v615_v40 }
  0x2d   : > { %512 = vmatprep.mubr.bf16.mxu0 %v1007_v27  ;;  %953 = vmatprep.subr.mxu1 %v614_v41 }
  0x2e   : > { %954 = vmatpush3.msra.mxu1 %v614_v41 }
  0x2f   : > { %955 = vmatprep.subr.mxu1 %v613_v42 }
  0x30   : > { %956 = vmatpush3.msra.mxu1 %v613_v42 }
  0x31   : > { %957 = vmatprep.subr.mxu1 %v612_v43 }
  0x32   : > { %958 = vmatpush3.msra.mxu1 %v612_v43 }
  0x33   : > { %959 = vmatprep.subr.mxu1 %v611_v44 }
  0x34   : > { %513 = vmatmul.mubr.bf16.gmra.mxu0 %v1009_v31  ;;  %960 = vmatpush3.msra.mxu1 %v611_v44 }
  0x35   : > { %520 = vmatprep.mubr.bf16.mxu0 %v1010_v33  ;;  %961 = vmatprep.subr.mxu1 %v610_v45 }
  0x36   : > { %962 = vmatpush3.msra.mxu1 %v610_v45 }
  0x3c   : > { %521 = vmatmul.mubr.bf16.gmra.mxu0 %v1012_v36 }
  0x3d   : > { %528 = vmatprep.mubr.bf16.mxu0 %v1015_v37 }
  0x44   : > { %529 = vmatmul.mubr.bf16.gmra.mxu0 %v1017_v38 }
  0xd6   : > { %v925_v46 = vpop.f32.mrf.mxu1 }
  0xd8   : > { %v571_v48 = vpop.f32.mrf.mxu1 }
  0xda   : > { %v926_v53 = vpop.f32.mrf.mxu1 }
  0xdc   : > { %v574_v59 = vpop.f32.mrf.mxu1 }
  0xde   : > { %v929_v5 = vpop.f32.mrf.mxu1 }
  0xe0   : > { %v587_v12 = vpop.f32.mrf.mxu1 }
  0xe2   : > { %v930_v19 = vpop.f32.mrf.mxu1 }
  0xe4   : > { %v590_v25 = vpop.f32.mrf.mxu1 }
  0xec   : > { %v865_v47 = vpop.f32.mrf.mxu0 }
  0xee   : > { %v866_v49 = vpop.f32.mrf.mxu0 }
  0xef   : > { %v867_v51 = vadd.f32 %v866_v49, %v865_v47 }
  0xf0   : > { %v868_v52 = vpop.f32.mrf.mxu0 }
  0xf1   : > { %v507_v54 = vadd.f32 %v867_v51, %v811_v50 }
  0xf2   : > { %v869_v55 = vpop.f32.mrf.mxu0 }
  0xf3   : > { %v870_v56 = vadd.f32 %v869_v55, %v868_v52  ;;  %v572_v57 = vadd.f32 %v571_v48, %v507_v54 }
  0xf4   : > { %v871_v58 = vpop.f32.mrf.mxu0 }
  0xf5   : > { %v602_v60 = vmax.f32 %v572_v57, 0.0  ;;  %v510_v61 = vadd.f32 %v870_v56, %v811_v50 }
  0xf6   : > { %v872_v62 = vpop.f32.mrf.mxu0 }
  0xf7   : > { %v873_v63 = vadd.f32 %v872_v62, %v871_v58  ;;  %v575_v0 = vadd.f32 %v574_v59, %v510_v61  ;;  %963 = vmatprep.mubr.f32.mxu1 %v602_v60 }
  0xf8   : > { %v874_v1 = vpop.f32.mrf.mxu0 }
  0xf9   : > { %v515_v2 = vadd.f32 %v873_v63, %v811_v50  ;;  %v603_v3 = vmax.f32 %v575_v0, 0.0 }
  0xfa   : > { %v875_v4 = vpop.f32.mrf.mxu0 }
  0xfb   : > { %v876_v6 = vadd.f32 %v875_v4, %v874_v1  ;;  %964 = vmatmul.mubr.f32.vlgmr.msra.gmra.mxu1 %v603_v3  ;;  %v580_v7 = vadd.f32 %v925_v46, %v515_v2 }
  0xfc   : > { %v877_v8 = vpop.f32.mrf.mxu0 }
  0xfd   : > { %v518_v9 = vadd.f32 %v876_v6, %v811_v50  ;;  %v604_v10 = vmax.f32 %v580_v7, 0.0 }
  0xfe   : > { %v878_v11 = vpop.f32.mrf.mxu0 }
  0xff   : > { %v879_v13 = vadd.f32 %v878_v11, %v877_v8  ;;  %966 = vmatprep.mubr.f32.mxu1 %v604_v10  ;;  %v583_v14 = vadd.f32 %v926_v53, %v518_v9 }
 0x100   : > { %v880_v15 = vpop.f32.mrf.mxu0 }
 0x101   : > { %v523_v16 = vadd.f32 %v879_v13, %v811_v50  ;;  %v605_v17 = vmax.f32 %v583_v14, 0.0 }
 0x102   : > { %v881_v18 = vpop.f32.mrf.mxu0 }
 0x103   : > { %v588_v20 = vadd.f32 %v587_v12, %v523_v16  ;;  %v882_v21 = vadd.f32 %v881_v18, %v880_v15  ;;  %967 = vmatmul.mubr.f32.gmra.mxu1 %v605_v17 }
 0x104   : > { %v883_v22 = vpop.f32.mrf.mxu0 }
 0x105   : > { %v606_v23 = vmax.f32 %v588_v20, 0.0  ;;  %v526_v24 = vadd.f32 %v882_v21, %v811_v50 }
 0x106   : > { %v884_v26 = vpop.f32.mrf.mxu0 }
 0x107   : > { %v591_v27 = vadd.f32 %v590_v25, %v526_v24  ;;  %v885_v28 = vadd.f32 %v884_v26, %v883_v22  ;;  %969 = vmatprep.mubr.f32.mxu1 %v606_v23 }
 0x108   : > { %v886_v29 = vpop.f32.mrf.mxu0 }
 0x109   : > { %v607_v30 = vmax.f32 %v591_v27, 0.0  ;;  %v531_v31 = vadd.f32 %v885_v28, %v811_v50 }
 0x10a   : > { %v887_v32 = vpop.f32.mrf.mxu0 }
 0x10b   : > { %v888_v33 = vadd.f32 %v887_v32, %v886_v29  ;;  %970 = vmatmul.mubr.f32.gmra.mxu1 %v607_v30  ;;  %v596_v34 = vadd.f32 %v929_v5, %v531_v31 }
 0x10d   : > { %v534_v35 = vadd.f32 %v888_v33, %v811_v50  ;;  %v608_v36 = vmax.f32 %v596_v34, 0.0 }
 0x10f   : > { %972 = vmatprep.mubr.f32.mxu1 %v608_v36  ;;  %v599_v37 = vadd.f32 %v930_v19, %v534_v35 }
 0x111   : > { %v609_v38 = vmax.f32 %v599_v37, 0.0 }
 0x113   : > { %973 = vmatmul.mubr.f32.gmra.mxu1 %v609_v38 }
 0x1bb   : > { %v965_v40 = vpop.f32.mrf.mxu1 }
 0x1bc   : > { %v705_v41 = vadd.f32 %v965_v40, %v846_v39 }
 0x1bd   : > { %v699_v42 = vpop.f32.mrf.mxu1 }
 0x1be   : > { %739 = vst [vmem:[%s229_s7 + $0x8] sm:$0xff] %v705_v41  ;;  %v700_v43 = vadd.f32 %v846_v39, %v699_v42 }
 0x1c0   : > { %738 = vst [vmem:[%s229_s7] sm:$0xff] %v700_v43 }
 0x1c3   : > { %v968_v44 = vpop.f32.mrf.mxu1 }
 0x1c4   : > { %v715_v45 = vadd.f32 %v968_v44, %v846_v39 }
 0x1c5   : > { %v709_v46 = vpop.f32.mrf.mxu1 }
 0x1c6   : > { %741 = vst [vmem:[%s229_s7 + $0x18] sm:$0xff] %v715_v45  ;;  %v710_v47 = vadd.f32 %v846_v39, %v709_v46 }
 0x1c8   : > { %740 = vst [vmem:[%s229_s7 + $0x10] sm:$0xff] %v710_v47 }
 0x1cb   : > { %v971_v48 = vpop.f32.mrf.mxu1 }
 0x1cc   : > { %v725_v49 = vadd.f32 %v971_v48, %v846_v39 }
 0x1cd   : > { %v719_v50 = vpop.f32.mrf.mxu1 }
 0x1ce   : > { %743 = vst [vmem:[%s229_s7 + $0x28] sm:$0xff] %v725_v49  ;;  %v720_v51 = vadd.f32 %v846_v39, %v719_v50 }
 0x1d0   : > { %742 = vst [vmem:[%s229_s7 + $0x20] sm:$0xff] %v720_v51 }
 0x1d3   : > { %v974_v52 = vpop.f32.mrf.mxu1 }
 0x1d4   : > { %v735_v53 = vadd.f32 %v974_v52, %v846_v39 }
 0x1d5   : > { %v729_v54 = vpop.f32.mrf.mxu1 }
 0x1d6   : > { %745 = vst [vmem:[%s229_s7 + $0x38] sm:$0xff] %v735_v53  ;;  %v730_v55 = vadd.f32 %v846_v39, %v729_v54 }
 0x1d8   : > { %744 = vst [vmem:[%s229_s7 + $0x30] sm:$0xff] %v730_v55 }
 0x1d9 PF: > { %s15_s18 = sadd.s32 1, %s1024_s18  }
 0x1da   : > { %p12_p4 = scmp.ge.s32.totalorder %s15_s18, 4  }
 0x1dc   :  { %14 = sbr.rel (!%p12_p4) target bundleno = 1 (0x1), region = 70 }

</bundles_post_ra>
